<compile_context>
chip_gen: v7x
topology: tpu7x:2x2x1
jax: 0.10.0
libtpu: 0.0.40
codegen_flags: <defaults>
</compile_context>

<pallas_src>
import functools

import jax
import jax.numpy as jnp
from jax.experimental import pallas as pl
from jax.experimental.pallas import tpu as pltpu


def _kv_cache_kernel(tok_ref, emb_ref, wqkv_ref, bqkv_ref, wl_ref, bl_ref,
                     out_ref, *, B: int, Tp: int, T: int, D: int):
    # tok_ref : (B*Tp, 1) int32 token ids (seq padded to Tp, multiple of 8)
    # emb_ref : (Vocab, D) bf16 embedding table
    # wqkv_ref: (D, 3D) bf16 fused [Wq^T | Wk^T | Wv^T];  bqkv_ref: (1, 3D) f32
    # wl_ref  : (D, Vpad) bf16 lm_head^T, zero-padded;    bl_ref  : (1, Vpad) f32
    # out_ref : (B*Tp, Vpad) f32, lane-dense
    BTp = B * Tp
    Vocab = emb_ref.shape[0]

    # Embedding lookup as one-hot @ table (exact row select, runs on the MXU).
    tok = tok_ref[...]                                                     # (BTp, 1)
    col = jax.lax.broadcasted_iota(jnp.int32, (BTp, Vocab), 1)
    onehot = (col == tok).astype(jnp.bfloat16)                             # (BTp, Vocab)
    x = jnp.dot(onehot, emb_ref[...],
                preferred_element_type=jnp.float32)                        # (BTp, D) f32

    # Fused QKV projection: one (BTp, D) @ (D, 3D) bf16 matmul, f32 accumulate.
    qkv = jnp.dot(x.astype(jnp.bfloat16), wqkv_ref[...],
                  preferred_element_type=jnp.float32) + bqkv_ref[...]      # (BTp, 3D) f32
    q = qkv[:, :D].astype(jnp.bfloat16).reshape(B, Tp, D)
    k = qkv[:, D:2 * D].astype(jnp.bfloat16).reshape(B, Tp, D)
    v = qkv[:, 2 * D:].astype(jnp.bfloat16).reshape(B, Tp, D)

    # attn = Q @ K^T @ V, batched over B (no softmax in the module).
    s = jnp.einsum("btd,bsd->bts", q, k,
                   preferred_element_type=jnp.float32)                     # (B, Tp, Tp)
    if Tp != T:
        # Zero contributions from padded key positions (exact: no softmax).
        key_pos = jax.lax.broadcasted_iota(jnp.int32, (B, Tp, Tp), 2)
        s = jnp.where(key_pos < T, s, 0.0)
    a = jnp.einsum("bts,bsd->btd", s.astype(jnp.bfloat16), v,
                   preferred_element_type=jnp.float32)                     # (B, Tp, D)

    # lm_head on the zero-padded, lane-dense vocab dim.
    a2 = a.reshape(BTp, D).astype(jnp.bfloat16)
    out = jnp.dot(a2, wl_ref[...],
                  preferred_element_type=jnp.float32) + bl_ref[...]        # (BTp, Vpad)
    out_ref[...] = out.astype(out_ref.dtype)


def prepare_params(params):
    """One-time weight preprocessing (hoisted out of the per-call wrapper)."""
    Vocab, D = params["emb"].shape
    Vpad = max(((Vocab + 127) // 128) * 128, 128)      # lane-dense output width
    wqkv = jnp.concatenate(
        [params["wq"].T, params["wk"].T, params["wv"].T], axis=1
    ).astype(jnp.bfloat16)                                                 # (D, 3D)
    bqkv = jnp.concatenate(
        [params["bq"], params["bk"], params["bv"]]
    ).reshape(1, 3 * D).astype(jnp.float32)                                # (1, 3D)
    wl_pad = jnp.zeros((D, Vpad), jnp.bfloat16).at[:, :Vocab].set(
        params["wl"].T.astype(jnp.bfloat16))                               # (D, Vpad)
    bl_pad = jnp.zeros((1, Vpad), jnp.float32).at[:, :Vocab].set(
        params["bl"].astype(jnp.float32))                                  # (1, Vpad)
    return {
        "emb": params["emb"].astype(jnp.bfloat16),                         # (Vocab, D)
        "wqkv": wqkv, "bqkv": bqkv, "wl": wl_pad, "bl": bl_pad,
    }


def kv_cache_forward(tokens, prepped):
    """tokens: (B, T) int32; prepped: prepare_params output. Returns (B, T, Vocab) f32."""
    B, T = tokens.shape
    emb = prepped["emb"]
    Vocab, D = emb.shape
    Vpad = prepped["wl"].shape[1]

    Tp = ((T + 7) // 8) * 8                             # sublane-aligned seq length
    BTp = B * Tp
    tok = jnp.zeros((B, Tp), jnp.int32).at[:, :T].set(tokens.astype(jnp.int32))
    tok_col = tok.reshape(BTp, 1)

    vmem = pl.BlockSpec(memory_space=pltpu.MemorySpace.VMEM)

    flops = 2 * BTp * (Vocab * D + 3 * D * D + D * Vpad) + 4 * B * Tp * Tp * D
    bytes_accessed = (4 * BTp                                   # tokens
                      + 2 * (Vocab * D + 3 * D * D + D * Vpad)  # bf16 weights
                      + 4 * (3 * D + Vpad)                      # f32 biases
                      + 4 * BTp * Vpad)                         # f32 output

    out = pl.pallas_call(
        functools.partial(_kv_cache_kernel, B=B, Tp=Tp, T=T, D=D),
        out_shape=jax.ShapeDtypeStruct((BTp, Vpad), jnp.float32),
        in_specs=[vmem] * 6,
        out_specs=vmem,
        cost_estimate=pl.CostEstimate(
            flops=flops, transcendentals=0, bytes_accessed=bytes_accessed),
    )(tok_col, emb, prepped["wqkv"], prepped["bqkv"], prepped["wl"], prepped["bl"])

    return out.reshape(B, Tp, Vpad)[:, :T, :Vocab]


def _init_params(key, D, Vocab):
    ks = jax.random.split(key, 9)
    scale = 1.0 / jnp.sqrt(D)
    return {
        "emb": jax.random.normal(ks[0], (Vocab, D), jnp.float32),
        "wq": jax.random.uniform(ks[1], (D, D), jnp.float32, -scale, scale),
        "bq": jax.random.uniform(ks[2], (D,), jnp.float32, -scale, scale),
        "wk": jax.random.uniform(ks[3], (D, D), jnp.float32, -scale, scale),
        "bk": jax.random.uniform(ks[4], (D,), jnp.float32, -scale, scale),
        "wv": jax.random.uniform(ks[5], (D, D), jnp.float32, -scale, scale),
        "bv": jax.random.uniform(ks[6], (D,), jnp.float32, -scale, scale),
        "wl": jax.random.uniform(ks[7], (Vocab, D), jnp.float32, -scale, scale),
        "bl": jax.random.uniform(ks[8], (Vocab,), jnp.float32, -scale, scale),
    }


def _reference_f32(tokens, params):
    """Pure-f32 reference matching the PyTorch module (first call, empty cache)."""
    x = params["emb"][tokens]                               # (B, T, D)
    q = x @ params["wq"].T + params["bq"]
    k = x @ params["wk"].T + params["bk"]
    v = x @ params["wv"].T + params["bv"]
    attn = jnp.einsum("btd,bsd->bts", q, k) @ v             # (B, T, D)
    return attn @ params["wl"].T + params["bl"]             # (B, T, Vocab)


def _reference_mixed(tokens, prepped):
    """Reference with the same bf16-operand / f32-accumulate numerics as the kernel."""
    emb = prepped["emb"]
    Vocab, D = emb.shape
    x = emb[tokens]                                                         # (B, T, D) bf16
    qkv = jnp.einsum("btd,de->bte", x, prepped["wqkv"],
                     preferred_element_type=jnp.float32) + prepped["bqkv"][0]
    q = qkv[..., :D].astype(jnp.bfloat16)
    k = qkv[..., D:2 * D].astype(jnp.bfloat16)
    v = qkv[..., 2 * D:].astype(jnp.bfloat16)
    s = jnp.einsum("btd,bsd->bts", q, k, preferred_element_type=jnp.float32)
    a = jnp.einsum("bts,bsd->btd", s.astype(jnp.bfloat16), v,
                   preferred_element_type=jnp.float32)
    out = jnp.einsum("btd,dv->btv", a.astype(jnp.bfloat16), prepped["wl"],
                     preferred_element_type=jnp.float32) + prepped["bl"][0]
    return out[..., :Vocab]


if __name__ == "__main__":
    D, Vocab = 128, 64           # module constants D=128, V=64
    B, T = 2, 10                 # module used seq=10; exercises the seq-padding path

    key = jax.random.PRNGKey(0)
    kp, kx = jax.random.split(key)
    params = _init_params(kp, D, Vocab)
    tokens = jax.random.randint(kx, (B, T), 0, Vocab, dtype=jnp.int32)

    prepped = prepare_params(params)                 # one-time weight prep
    out = kv_cache_forward(tokens, prepped)
    out = jax.block_until_ready(out)
    assert out.shape == (B, T, Vocab)

    # Tight check against a reference with identical bf16/f32-acc numerics.
    ref_mixed = _reference_mixed(tokens, prepped)
    assert jnp.allclose(out, ref_mixed, rtol=1e-3, atol=1e-3), "mismatch vs bf16 reference"

    # Loose check against the pure-f32 module semantics (tolerance covers bf16 operands).
    ref_f32 = _reference_f32(tokens, params)
    assert jnp.allclose(out, ref_f32, rtol=5e-2, atol=2e-1), "mismatch vs f32 reference"

    print("KERNEL_OK")
</pallas_src>

<mosaic_0001>
module attributes {stable_mosaic.version = 11 : i64} {
  func.func @_kv_cache_kernel(%arg0: memref<32x1xi32, #tpu.memory_space<vmem>>, %arg1: memref<64x128xbf16, #tpu.memory_space<vmem>>, %arg2: memref<128x384xbf16, #tpu.memory_space<vmem>>, %arg3: memref<1x384xf32, #tpu.memory_space<vmem>>, %arg4: memref<128x128xbf16, #tpu.memory_space<vmem>>, %arg5: memref<1x128xf32, #tpu.memory_space<vmem>>, %arg6: memref<32x128xf32, #tpu.memory_space<vmem>>) attributes {dimension_semantics = [], scalar_prefetch = 0 : i64, scratch_operands = 0 : i64, tpu.core_type = #tpu.core_type<tc>} {
    %c0 = arith.constant 0 : index
    %c0_0 = arith.constant 0 : index
    %0 = vector.load %arg0[%c0, %c0_0] : memref<32x1xi32, #tpu.memory_space<vmem>>, vector<32x1xi32>
    %1 = tpu.iota {dimensions = array<i32: 1>} : vector<32x64xi32>
    %2 = vector.broadcast %0 : vector<32x1xi32> to vector<32x64xi32>
    %3 = arith.cmpi eq, %1, %2 : vector<32x64xi32>
    %4 = arith.extui %3 : vector<32x64xi1> to vector<32x64xi32>
    %5 = arith.sitofp %4 : vector<32x64xi32> to vector<32x64xf32>
    %6 = arith.truncf %5 : vector<32x64xf32> to vector<32x64xbf16>
    %c0_1 = arith.constant 0 : index
    %c0_2 = arith.constant 0 : index
    %7 = vector.load %arg1[%c0_1, %c0_2] : memref<64x128xbf16, #tpu.memory_space<vmem>>, vector<64x128xbf16>
    %cst = arith.constant dense<0.000000e+00> : vector<32x128xf32>
    %8 = tpu.matmul %6, %7, %cst {dimension_numbers = #tpu.dot_dimension_numbers<[1], [0], [0], [1], [0, 0, 1, 1], [], []>} : vector<32x64xbf16>, vector<64x128xbf16>, vector<32x128xf32> -> vector<32x128xf32>
    %9 = arith.truncf %8 : vector<32x128xf32> to vector<32x128xbf16>
    %c0_3 = arith.constant 0 : index
    %c0_4 = arith.constant 0 : index
    %10 = vector.load %arg2[%c0_3, %c0_4] : memref<128x384xbf16, #tpu.memory_space<vmem>>, vector<128x384xbf16>
    %cst_5 = arith.constant dense<0.000000e+00> : vector<32x384xf32>
    %11 = tpu.matmul %9, %10, %cst_5 {dimension_numbers = #tpu.dot_dimension_numbers<[1], [0], [0], [1], [0, 0, 1, 1], [], []>} : vector<32x128xbf16>, vector<128x384xbf16>, vector<32x384xf32> -> vector<32x384xf32>
    %c0_6 = arith.constant 0 : index
    %c0_7 = arith.constant 0 : index
    %12 = vector.load %arg3[%c0_6, %c0_7] : memref<1x384xf32, #tpu.memory_space<vmem>>, vector<1x384xf32>
    %13 = vector.broadcast %12 : vector<1x384xf32> to vector<32x384xf32>
    %14 = arith.addf %11, %13 : vector<32x384xf32>
    %15 = vector.extract_strided_slice %14 {offsets = [0, 0], sizes = [32, 128], strides = [1, 1]} : vector<32x384xf32> to vector<32x128xf32>
    %16 = arith.truncf %15 : vector<32x128xf32> to vector<32x128xbf16>
    %17 = vector.shape_cast %16 : vector<32x128xbf16> to vector<2x16x128xbf16>
    %18 = vector.extract_strided_slice %14 {offsets = [0, 128], sizes = [32, 128], strides = [1, 1]} : vector<32x384xf32> to vector<32x128xf32>
    %19 = arith.truncf %18 : vector<32x128xf32> to vector<32x128xbf16>
    %20 = vector.shape_cast %19 : vector<32x128xbf16> to vector<2x16x128xbf16>
    %21 = vector.extract_strided_slice %14 {offsets = [0, 256], sizes = [32, 128], strides = [1, 1]} : vector<32x384xf32> to vector<32x128xf32>
    %22 = arith.truncf %21 : vector<32x128xf32> to vector<32x128xbf16>
    %23 = vector.shape_cast %22 : vector<32x128xbf16> to vector<2x16x128xbf16>
    "tpu.trace_start"() <{level = 10 : i32, message = "btd,bsd->bts"}> : () -> ()
    %cst_8 = arith.constant dense<0.000000e+00> : vector<2x16x16xf32>
    %24 = tpu.matmul %17, %20, %cst_8 {dimension_numbers = #tpu.dot_dimension_numbers<[2], [2], [1], [1], [0, 0, 0, 1, 1, 1], [0], [0]>} : vector<2x16x128xbf16>, vector<2x16x128xbf16>, vector<2x16x16xf32> -> vector<2x16x16xf32>
    "tpu.trace_stop"() : () -> ()
    %25 = tpu.iota {dimensions = array<i32: 2>} : vector<2x16x16xi32>
    %c10_i32 = arith.constant 10 : i32
    %26 = vector.broadcast %c10_i32 : i32 to vector<2x16x16xi32>
    %27 = arith.cmpi slt, %25, %26 : vector<2x16x16xi32>
    %cst_9 = arith.constant 0.000000e+00 : f32
    %28 = vector.broadcast %cst_9 : f32 to vector<2x16x16xf32>
    %29 = arith.select %27, %24, %28 : vector<2x16x16xi1>, vector<2x16x16xf32>
    %30 = arith.truncf %29 : vector<2x16x16xf32> to vector<2x16x16xbf16>
    "tpu.trace_start"() <{level = 10 : i32, message = "bts,bsd->btd"}> : () -> ()
    %cst_10 = arith.constant dense<0.000000e+00> : vector<2x16x128xf32>
    %31 = tpu.matmul %30, %23, %cst_10 {dimension_numbers = #tpu.dot_dimension_numbers<[2], [1], [1], [2], [0, 0, 0, 1, 1, 2], [0], [0]>} : vector<2x16x16xbf16>, vector<2x16x128xbf16>, vector<2x16x128xf32> -> vector<2x16x128xf32>
    "tpu.trace_stop"() : () -> ()
    %32 = vector.shape_cast %31 : vector<2x16x128xf32> to vector<32x128xf32>
    %33 = arith.truncf %32 : vector<32x128xf32> to vector<32x128xbf16>
    %c0_11 = arith.constant 0 : index
    %c0_12 = arith.constant 0 : index
    %34 = vector.load %arg4[%c0_11, %c0_12] : memref<128x128xbf16, #tpu.memory_space<vmem>>, vector<128x128xbf16>
    %cst_13 = arith.constant dense<0.000000e+00> : vector<32x128xf32>
    %35 = tpu.matmul %33, %34, %cst_13 {dimension_numbers = #tpu.dot_dimension_numbers<[1], [0], [0], [1], [0, 0, 1, 1], [], []>} : vector<32x128xbf16>, vector<128x128xbf16>, vector<32x128xf32> -> vector<32x128xf32>
    %c0_14 = arith.constant 0 : index
    %c0_15 = arith.constant 0 : index
    %36 = vector.load %arg5[%c0_14, %c0_15] : memref<1x128xf32, #tpu.memory_space<vmem>>, vector<1x128xf32>
    %37 = vector.broadcast %36 : vector<1x128xf32> to vector<32x128xf32>
    %38 = arith.addf %35, %37 : vector<32x128xf32>
    %c0_16 = arith.constant 0 : index
    %c0_17 = arith.constant 0 : index
    %39 = vector.load %arg6[%c0_16, %c0_17] : memref<32x128xf32, #tpu.memory_space<vmem>>, vector<32x128xf32>
    tpu.vector_store %arg6[%c0_16, %c0_17], %38 {strides = array<i32>} : memref<32x128xf32, #tpu.memory_space<vmem>>, vector<32x128xf32>,
    return
  }
}

</mosaic_0001>

<bundles_post_ra>
// kernel: tpu_custom_call.1
= control target key start
LH: loop header
LB: loop body
LE: loop exit
PB: predicated region body
PF: predicated region fallthrough
CT: control target
= control target key end

     0   :  { %11 = vsyncpa [#allocation3], 0  ;;  %s1217_s0 = inlined_call_operand.vmem [shape: s32[32,1], index: 0, kind: input, shape index: {}]   ;;  %s1218_s1 = inlined_call_operand.vmem [shape: bf16[64,128], index: 1, kind: input, shape index: {}]   ;;  %s1219_s2 = inlined_call_operand.hbm [shape: bf16[128,384], index: 2, kind: input, shape index: {}]   ;;  %s1220_s3 = inlined_call_operand.vmem [shape: f32[1,384], index: 3, kind: input, shape index: {}]   ;;  %s1221_s4 = inlined_call_operand.hbm [shape: bf16[128,128], index: 4, kind: input, shape index: {}]   ;;  %s1222_s5 = inlined_call_operand.vmem [shape: f32[1,128], index: 5, kind: input, shape index: {}]   ;;  %s1223_s6 = inlined_call_operand.hbm [shape: f32[32,128], index: 6, kind: output, shape index: {}]  }
   0x1   :  { %12 = vsyncpa [#allocation6], 0 }
   0x2   :  { %13 = vsyncpa [#allocation4], 0  ;;  %s1067_s21 = smov [#allocation2]   ;;  %s995_s25 = scalar_lea.hbm %s1219_s2, 3072 }
   0x3   :  { %s23_s22 = sshll.u32 %s1067_s21, 4  ;;  %p996_p0 = scmp.ne.s32.totalorder %s1219_s2, %s995_s25  ;;  %s24_s22 = int_to_ptr.vmem [resolvable:$true] %s23_s22 }
   0x4   :  { %p999_p1 = scmp.lt.u32.totalorder %s995_s25, %s1219_s2 }
   0x6   :  { %p1001_p2 = pnand %p999_p1, %p996_p0 }
   0x8   :  { %1004 = shalt.err (!%p1001_p2)
}
   0x9   :  { %s1005_s30 = scalar_lea.vmem %s24_s22, 3072  ;;  %p1010_p4 = scmp.lt.s32.totalorder %s24_s22, %s24_s22 }
   0xa   :  { %p1006_p3 = scmp.ne.s32.totalorder %s24_s22, %s1005_s30  ;;  %p1011_p5 = scmp.lt.s32.totalorder %s1005_s30, %s1005_s30 }
   0xc   :  { %p1012_p6 = por %p1011_p5, %p1010_p4 }
   0xe   :  { %p1013_p7 = pnand %p1012_p6, %p1006_p3 }
  0x10   :  { %1016 = shalt.err (!%p1013_p7)
}
  0x11   :  { %s1068_s7 = smov 192   ;;  %s1069_s8 = smov 12  }
  0x12   :  { %29 = dma.hbm_to_vmem [thread:$0]  %s1219_s2, 3072, %s24_s22, [#allocation3], %s1068_s7, %s1068_s7, %s1069_s8  }
  0x13   :  { %s1070_s11 = smov [#allocation5]   ;;  %s1017_s15 = scalar_lea.hbm %s1221_s4, 1024 }
  0x14   :  { %s37_s12 = sshll.u32 %s1070_s11, 4  ;;  %p1018_p8 = scmp.ne.s32.totalorder %s1221_s4, %s1017_s15  ;;  %s38_s12 = int_to_ptr.vmem [resolvable:$true] %s37_s12 }
  0x15   :  { %p1021_p9 = scmp.lt.u32.totalorder %s1017_s15, %s1221_s4 }
  0x17   :  { %p1023_p10 = pnand %p1021_p9, %p1018_p8 }
  0x19   :  { %1026 = shalt.err (!%p1023_p10)
}
  0x1a   :  { %s1027_s20 = scalar_lea.vmem %s38_s12, 1024  ;;  %p1032_p12 = scmp.lt.s32.totalorder %s38_s12, %s38_s12 }
  0x1b   :  { %p1028_p11 = scmp.ne.s32.totalorder %s38_s12, %s1027_s20  ;;  %p1033_p13 = scmp.lt.s32.totalorder %s1027_s20, %s1027_s20 }
  0x1d   :  { %p1034_p0 = por %p1033_p13, %p1032_p12 }
  0x1f   :  { %p1035_p1 = pnand %p1034_p0, %p1028_p11 }
  0x21   :  { %1038 = shalt.err (!%p1035_p1)
}
  0x22   :  { %s1071_s2 = smov 64   ;;  %s1072_s21 = smov 4  }
  0x23   :  { %43 = dma.hbm_to_vmem [thread:$0]  %s1221_s4, 1024, %s38_s12, [#allocation6], %s1071_s2, %s1071_s2, %s1072_s21  }
  0x24   :  { %1061 = dma.done.wait [#allocation3], 3072  }
  0x25   :  { %1062 = vsyncadd [#allocation3], 4294964224 }
  0x26   :  { %1063 = dma.done.wait [#allocation6], 1024  }
  0x27   :  { %1064 = vsyncadd [#allocation6], 4294966272  ;;  %v1073_v0 = vmov 0   ;;  %v55_v1 = vld [vmem:[%s1217_s0 + $0x10] sm:$0xff]  ;;  %v53_v2 = vld [vmem:[%s1217_s0] sm:$0xff]  ;;  %v57_v24 = vlaneseq  ;;  %vm117_vm4 = vcmask 523264  }
  0x28   :  { %950 = vset.pattern.permute.xlu1 %v1073_v0  ;;  %949 = vset.pattern.permute.xlu0 %v1073_v0  ;;  %v56_v3 = vld [vmem:[%s1217_s0 + $0x18] sm:$0xff]  ;;  %v54_v4 = vld [vmem:[%s1217_s0 + $0x8] sm:$0xff]  ;;  %v951_v5 = vld [vmem:[%s1218_s1] sm:$0xff]   ;;  %v1074_v30 = vmov 0.0   ;;  %vm1075_vm5 = vmmov 0   ;;  %vm549_vm7 = vcmask 130048  }
  0x29   :  { %384 = vmatprep.mubr.bf16.mxu1 %v1073_v0  ;;  %66 = vperm.xlu1 %950, %v55_v1   ;;  %v952_v6 = vld [vmem:[%s1218_s1 + $0x8] sm:$0xff]   ;;  %v953_v7 = vld [vmem:[%s1218_s1 + $0x10] sm:$0xff]   ;;  %v954_v10 = vld [vmem:[%s1218_s1 + $0x18] sm:$0xff]   ;;  %v1165_v25 = vand.u32 127, %v57_v24  ;;  %v210_v52 = vshrl.u32 %v57_v24, 7  ;;  %s1076_s16 = smov [#allocation7]  }
  0x2a   :  { %60 = vperm.xlu0 %949, %v53_v2   ;;  %861 = vmatprep.subr.bf16.mxu0 %v951_v5  ;;  %v955_v8 = vld [vmem:[#allocation2 + $0x4] ss:$12 sps:$4 sm:$0xff]   ;;  %v957_v9 = vld [vmem:[#allocation2] ss:$12 sps:$4 sm:$0xff]   ;;  %v959_v11 = vld [vmem:[#allocation2 + $0x1c] ss:$12 sps:$4 sm:$0xff]  }
  0x2b   :  { %862 = vmatpush3.bf16.msra.mxu0 %v951_v5  ;;  %v961_v12 = vld [vmem:[#allocation2 + $0x18] ss:$12 sps:$4 sm:$0xff]   ;;  %352 = vmatprep.subr.bf16.mxu1 %v955_v8  ;;  %v958_v13 = vld [vmem:[#allocation2 + $0x8] ss:$12 sps:$4 sm:$0xff]   ;;  %v965_v15 = vld [vmem:[#allocation2 + $0x30] ss:$12 sps:$4 sm:$0xff]  }
  0x2c   :  { %863 = vmatprep.subr.bf16.mxu0 %v952_v6  ;;  %353 = vmatpush1.bf16.msra.mxu1 %v957_v9  ;;  %v963_v14 = vld [vmem:[#allocation2 + $0x34] ss:$12 sps:$4 sm:$0xff]   ;;  %v967_v16 = vld [vmem:[#allocation2 + $0x4c] ss:$12 sps:$4 sm:$0xff]   ;;  %v971_v18 = vld [vmem:[#allocation2 + $0x64] ss:$12 sps:$4 sm:$0xff]  }
  0x2d   :  { %69 = vperm.xlu1 %950, %v56_v3   ;;  %354 = vmatprep.subr.bf16.mxu1 %v959_v11  ;;  %v969_v17 = vld [vmem:[#allocation2 + $0x48] ss:$12 sps:$4 sm:$0xff]   ;;  %v973_v19 = vld [vmem:[#allocation2 + $0x60] ss:$12 sps:$4 sm:$0xff]   ;;  %v977_v21 = vld [vmem:[#allocation2 + $0x78] ss:$12 sps:$4 sm:$0xff]  }
  0x2e   :  { %63 = vperm.xlu0 %949, %v54_v4   ;;  %v975_v20 = vld [vmem:[#allocation2 + $0x7c] ss:$12 sps:$4 sm:$0xff]   ;;  %v979_v22 = vld [vmem:[#allocation2 + $0x94] ss:$12 sps:$4 sm:$0xff]   ;;  %v966_v38 = vld [vmem:[#allocation2 + $0x38] ss:$12 sps:$4 sm:$0xff]  }
  0x2f   :  { %864 = vmatpush3.bf16.msra.mxu0 %v952_v6  ;;  %v981_v23 = vld [vmem:[#allocation2 + $0x90] ss:$12 sps:$4 sm:$0xff]   ;;  %v962_v37 = vld [vmem:[#allocation2 + $0x20] ss:$12 sps:$4 sm:$0xff]   ;;  %v974_v40 = vld [vmem:[#allocation2 + $0x68] ss:$12 sps:$4 sm:$0xff]  }
  0x30   :  { %865 = vmatprep.subr.bf16.mxu0 %v953_v7  ;;  %355 = vmatpush1.bf16.msra.mxu1 %v961_v12  ;;  %v970_v39 = vld [vmem:[#allocation2 + $0x50] ss:$12 sps:$4 sm:$0xff]   ;;  %v978_v41 = vld [vmem:[#allocation2 + $0x80] ss:$12 sps:$4 sm:$0xff]   ;;  %v982_v42 = vld [vmem:[#allocation2 + $0x98] ss:$12 sps:$4 sm:$0xff]  }
  0x31   :  { %356 = vmatprep.subr.bf16.mxu1 %v963_v14  ;;  %v983_v43 = vld [vmem:[#allocation2 + $0xac] ss:$12 sps:$4 sm:$0xff]   ;;  %v985_v44 = vld [vmem:[#allocation2 + $0xa8] ss:$12 sps:$4 sm:$0xff]   ;;  %v986_v45 = vld [vmem:[#allocation2 + $0xb0] ss:$12 sps:$4 sm:$0xff]  }
  0x32   :  { %v211_v53 = vsub.s32 0, %v210_v52  ;;  %v207_v54 = vld [vmem:[%s1220_s3] sm:$0x7]  ;;  %v215_v55 = vsub.s32 1, %v210_v52  ;;  %v219_v56 = vsub.s32 2, %v210_v52  ;;  %vm542_vm6 = vcmp.lt.s32.totalorder %v1165_v25, 10 }
  0x33   :  { %866 = vmatpush3.bf16.msra.mxu0 %v953_v7  ;;  %s769_s17 = sshll.u32 %s1076_s16, 4  ;;  %s770_s17 = int_to_ptr.vmem [resolvable:$true] %s769_s17 }
  0x34   :  { %867 = vmatprep.subr.bf16.mxu0 %v954_v10  ;;  %357 = vmatpush1.bf16.msra.mxu1 %v965_v15  ;;  %v212_v57 = vrot.slane %v207_v54, %v211_v53  ;;  %v216_v59 = vrot.slane %v207_v54, %v215_v55  ;;  %v220_v60 = vrot.slane %v207_v54, %v219_v56  ;;  %s1039_s18 = scalar_lea.vmem %s770_s17, 512  ;;  %p1044_p3 = scmp.lt.s32.totalorder %s770_s17, %s770_s17 }
  0x35   :  { %358 = vmatprep.subr.bf16.mxu1 %v967_v16  ;;  %p1040_p2 = scmp.ne.s32.totalorder %s770_s17, %s1039_s18  ;;  %p1045_p4 = scmp.lt.s32.totalorder %s1039_s18, %s1039_s18 }
  0x37   :  { %868 = vmatpush3.bf16.msra.mxu0 %v954_v10  ;;  %p1046_p5 = por %p1045_p4, %p1044_p3 }
  0x38   :  { %873 = vmatprep.subr.bf16.mxu0 %v958_v13  ;;  %359 = vmatpush1.bf16.msra.mxu1 %v969_v17 }
  0x39   :  { %360 = vmatprep.subr.bf16.mxu1 %v971_v18  ;;  %p1047_p6 = pnand %p1046_p5, %p1040_p2 }
  0x3c   :  { %361 = vmatpush1.bf16.msra.mxu1 %v973_v19 }
  0x3d   :  { %362 = vmatprep.subr.bf16.mxu1 %v975_v20 }
  0x40   :  { %363 = vmatpush1.bf16.msra.mxu1 %v977_v21 }
  0x41   :  { %364 = vmatprep.subr.bf16.mxu1 %v979_v22 }
  0x44   :  { %365 = vmatpush1.bf16.msra.mxu1 %v981_v23 }
  0x45   :  { %366 = vmatprep.subr.bf16.mxu1 %v983_v43 }
  0x48   :  { %367 = vmatpush1.bf16.msra.mxu1 %v985_v44  ;;  %v990_v44 = vld [vmem:[#allocation5 + $0x18] sm:$0xff]  }
  0x49   :  { %905 = vmatprep.subr.bf16.mxu1 %v1074_v30 }
  0xa8   :  { %v67_v26 = vpop.permute.xlu1 %66 }
  0xa9   :  { %v61_v27 = vpop.permute.xlu0 %60  ;;  %vm73_vm0 = vcmp.eq.s32.totalorder %v1165_v25, %v67_v26 }
  0xaa   :  { %vm71_vm1 = vcmp.eq.s32.totalorder %v1165_v25, %v61_v27  ;;  %v784_v31 = vsel %vm73_vm0, 1.0, %v1074_v30  ;;  %v987_v27 = vld [vmem:[#allocation5] sm:$0xff]  }
  0xab   :  { %v782_v32 = vsel %vm71_vm1, 1.0, %v1074_v30 }
  0xac   :  { %v70_v28 = vpop.permute.xlu1 %69 }
  0xad   :  { %v64_v29 = vpop.permute.xlu0 %63  ;;  %vm74_vm2 = vcmp.eq.s32.totalorder %v1165_v25, %v70_v28 }
  0xae   :  { %vm72_vm3 = vcmp.eq.s32.totalorder %v1165_v25, %v64_v29  ;;  %v785_v33 = vsel %vm74_vm2, 1.0, %v1074_v30  ;;  %v994_v25 = vld [vmem:[#allocation5 + $0x38] sm:$0xff]  }
  0xaf   :  { %v783_v34 = vsel %vm72_vm3, 1.0, %v1074_v30  ;;  %v84_v35 = vpack.c.bf16 %v785_v33, %v784_v31 }
  0xb0   :  { %v83_v36 = vpack.c.bf16 %v783_v34, %v782_v32 }
  0xb2   :  { %869 = vmatprep.mubr.msk.bf16.mxu0 %vm117_vm4, %v83_v36  ;;  %v988_v36 = vld [vmem:[#allocation5 + $0x8] sm:$0xff]  }
  0xb3   :  { %870 = vmatmul.mubr.msk.bf16.vlgmr.msra.gmra.mrb[0].mxu0 %vm117_vm4, %v84_v35 }
  0xb4   :  { %874 = vmatpush3.bf16.msra.mxu0 %v958_v13 }
  0xb5   :  { %875 = vmatprep.subr.bf16.mxu0 %v962_v37 }
  0xb8   :  { %876 = vmatpush3.bf16.msra.mxu0 %v962_v37  ;;  %v989_v37 = vld [vmem:[#allocation5 + $0x10] sm:$0xff]  }
  0xb9   :  { %877 = vmatprep.subr.bf16.mxu0 %v966_v38 }
  0xbc   :  { %878 = vmatpush3.bf16.msra.mxu0 %v966_v38 }
  0xbd   :  { %879 = vmatprep.subr.bf16.mxu0 %v970_v39 }
  0xc0   :  { %880 = vmatpush3.bf16.msra.mxu0 %v970_v39 }
  0xc1   :  { %881 = vmatprep.subr.bf16.mxu0 %v974_v40 }
  0xc4   :  { %882 = vmatpush3.bf16.msra.mxu0 %v974_v40 }
  0xc5   :  { %883 = vmatprep.subr.bf16.mxu0 %v978_v41 }
  0xc8   :  { %884 = vmatpush3.bf16.msra.mxu0 %v978_v41 }
  0xc9   :  { %885 = vmatprep.subr.bf16.mxu0 %v982_v42 }
  0xcc   :  { %886 = vmatpush3.bf16.msra.mxu0 %v982_v42 }
  0xcd   :  { %887 = vmatprep.subr.bf16.mxu0 %v986_v45 }
  0xd0   :  { %888 = vmatpush3.bf16.msra.mxu0 %v986_v45  ;;  %v991_v45 = vld [vmem:[#allocation5 + $0x20] sm:$0xff]  }
  0xd1   :  { %893 = vmatprep.subr.bf16.mxu0 %v1074_v30 }
 0x186   :  { %v871_v46 = vpop.f32.mrb[0].mxu0 }
 0x187   :  { %v158_v47 = vpop.f32.mrb[1].mxu0 }
 0x188   :  { %v872_v48 = vpop.f32.mrb[2].mxu0 }
 0x189   :  { %v174_v49 = vpack.c.bf16 %v872_v48, %v871_v46  ;;  %v161_v50 = vpop.f32.mrb[3].mxu0  ;;  %v992_v46 = vld [vmem:[#allocation5 + $0x28] sm:$0xff]  }
 0x18a   :  { %v173_v51 = vpack.c.bf16 %v161_v50, %v158_v47  ;;  %v993_v47 = vld [vmem:[#allocation5 + $0x30] sm:$0xff]  }
 0x18c   :  { %385 = vmatmul.mubr.bf16.vlgmr.msra.gmra.mrb[0].mxu1 %v173_v51  ;;  %889 = vmatprep.mubr.bf16.mxu0 %v173_v51 }
 0x18d   :  { %890 = vmatmul.mubr.bf16.vlgmr.msra.gmra.mrb[4].mxu0 %v174_v49  ;;  %394 = vmatprep.mubr.bf16.mxu1 %v1073_v0 }
 0x18e   :  { %895 = vmatprep.mubr.msk.bf16.mxu0 %vm1075_vm5, %v1074_v30 }
 0x194   :  { %395 = vmatmul.mubr.bf16.gmra.mrb[4].mxu1 %v174_v49 }
 0x195   :  { %907 = vmatprep.mubr.msk.bf16.mxu1 %vm1075_vm5, %v1074_v30 }
 0x25f   :  { %v386_v58 = vpop.f32.mrb[0].mxu1 }
 0x260   :  { %v388_v61 = vpop.f32.mrb[1].mxu1  ;;  %v891_v62 = vpop.f32.mrb[4].mxu0  ;;  %v387_v1 = vadd.f32 %v386_v58, %v212_v57  ;;  %v818_v58 = vld [vmem:[%s1222_s5] ss:$0 sm:$0xff] }
 0x261   :  { %v390_v63 = vpop.f32.mrb[2].mxu1  ;;  %v439_v0 = vpop.f32.mrb[5].mxu0  ;;  %v389_v5 = vadd.f32 %v388_v61, %v216_v59  ;;  %v448_v6 = vadd.f32 %v891_v62, %v220_v60 }
 0x262   :  { %v391_v2 = vadd.f32 %v390_v63, %v212_v57  ;;  %v392_v3 = vpop.f32.mrb[3].mxu1  ;;  %v892_v4 = vpop.f32.mrb[6].mxu0  ;;  %v440_v11 = vadd.f32 %v439_v0, %v220_v60 }
 0x263   :  { %v393_v7 = vadd.f32 %v392_v3, %v216_v59  ;;  %v451_v8 = vadd.f32 %v892_v4, %v220_v60  ;;  %v442_v9 = vpop.f32.mrb[7].mxu0 }
 0x264   :  { %v454_v10 = vpack.c.bf16 %v391_v2, %v387_v1  ;;  %v443_v12 = vadd.f32 %v442_v9, %v220_v60 }
 0x265   :  { %v456_v13 = vpack.c.bf16 %v393_v7, %v389_v5  ;;  %v459_v14 = vpack.c.bf16 %v451_v8, %v448_v6 }
 0x266   :  { %v458_v15 = vpack.c.bf16 %v443_v12, %v440_v11 }
 0x267   :  { %v396_v16 = vpop.f32.mrb[4].mxu1  ;;  %894 = vmatpush3.bf16.xpose.msra.mxu0 %v456_v13 }
 0x268   :  { %v398_v17 = vpop.f32.mrb[5].mxu1  ;;  %906 = vmatpush3.bf16.msra.mxu1 %v458_v15  ;;  %899 = vmatprep.subr.bf16.mxu0 %v1074_v30  ;;  %v397_v19 = vadd.f32 %v396_v16, %v212_v57 }
 0x269   :  { %v400_v18 = vpop.f32.mrb[6].mxu1  ;;  %v399_v22 = vadd.f32 %v398_v17, %v216_v59  ;;  %917 = vmatprep.subr.bf16.mxu1 %v987_v27 }
 0x26a   :  { %v401_v20 = vadd.f32 %v400_v18, %v212_v57  ;;  %v402_v21 = vpop.f32.mrb[7].mxu1 }
 0x26b   :  { %v403_v23 = vadd.f32 %v402_v21, %v216_v59 }
 0x26c   :  { %v455_v24 = vpack.c.bf16 %v401_v20, %v397_v19 }
 0x26d   :  { %v457_v26 = vpack.c.bf16 %v403_v23, %v399_v22 }
 0x26e   :  { %896 = vmatmul.mubr.bf16.vlgmr.msra.gmra.mrb[8].mxu0 %v454_v10 }
 0x26f   :  { %900 = vmatpush3.bf16.xpose.msra.mxu0 %v457_v26  ;;  %901 = vmatprep.mubr.msk.bf16.mxu0 %vm1075_vm5, %v1074_v30 }
 0x270   :  { %911 = vmatprep.subr.bf16.mxu0 %v1074_v30 }
 0x276   :  { %902 = vmatmul.mubr.bf16.vlgmr.msra.gmra.mrb[12].mxu0 %v455_v24 }
 0x277   :  { %912 = vmatpush3.bf16.msra.mxu0 %v459_v14  ;;  %913 = vmatprep.mubr.msk.bf16.mxu0 %vm1075_vm5, %v1074_v30 }
 0x341   :  { %v494_v28 = vpop.f32.mrb[8].mxu0 }
 0x342   :  { %v897_v29 = vpop.f32.mrb[9].mxu0  ;;  %v543_v32 = vsel %vm542_vm6, %v494_v28, 0.0 }
 0x343   :  { %v497_v31 = vpop.f32.mrb[10].mxu0 }
 0x344   :  { %v544_v33 = vsel %vm542_vm6, %v497_v31, 0.0  ;;  %v898_v34 = vpop.f32.mrb[11].mxu0 }
 0x345   :  { %v547_v35 = vpack.c.bf16 %v544_v33, %v543_v32 }
 0x347   :  { %908 = vmatmul.mubr.msk.bf16.vlgmr.msra.gmra.mrb[8].mxu1 %vm549_vm7, %v547_v35 }
 0x348   :  { %918 = vmatpush3.bf16.msra.mxu1 %v987_v27 }
 0x349   :  { %v535_v30 = vpop.f32.mrb[12].mxu0  ;;  %919 = vmatprep.subr.bf16.mxu1 %v988_v36 }
 0x34a   :  { %v903_v38 = vpop.f32.mrb[13].mxu0  ;;  %v545_v40 = vsel %vm542_vm6, %v535_v30, 0.0 }
 0x34b   :  { %v538_v39 = vpop.f32.mrb[14].mxu0 }
 0x34c   :  { %v546_v41 = vsel %vm542_vm6, %v538_v39, 0.0  ;;  %v904_v42 = vpop.f32.mrb[15].mxu0  ;;  %920 = vmatpush3.bf16.msra.mxu1 %v988_v36 }
 0x34d   :  { %v548_v43 = vpack.c.bf16 %v546_v41, %v545_v40  ;;  %921 = vmatprep.subr.bf16.mxu1 %v989_v37 }
 0x34f   :  { %914 = vmatmul.mubr.msk.bf16.vlgmr.msra.gmra.mrb[16].mxu0 %vm549_vm7, %v548_v43 }
 0x350   :  { %922 = vmatpush3.bf16.msra.mxu1 %v989_v37 }
 0x351   :  { %923 = vmatprep.subr.bf16.mxu1 %v990_v44 }
 0x354   :  { %924 = vmatpush3.bf16.msra.mxu1 %v990_v44 }
 0x355   :  { %925 = vmatprep.subr.bf16.mxu1 %v991_v45 }
 0x358   :  { %926 = vmatpush3.bf16.msra.mxu1 %v991_v45 }
 0x359   :  { %927 = vmatprep.subr.bf16.mxu1 %v992_v46 }
 0x35c   :  { %928 = vmatpush3.bf16.msra.mxu1 %v992_v46 }
 0x35d   :  { %929 = vmatprep.subr.bf16.mxu1 %v993_v47 }
 0x360   :  { %930 = vmatpush3.bf16.msra.mxu1 %v993_v47 }
 0x361   :  { %931 = vmatprep.subr.bf16.mxu1 %v994_v25 }
 0x364   :  { %932 = vmatpush3.bf16.msra.mxu1 %v994_v25 }
 0x41a   :  { %v587_v48 = vpop.f32.mrb[8].mxu1 }
 0x41b   :  { %v909_v49 = vpop.f32.mrb[9].mxu1 }
 0x41c   :  { %v590_v50 = vpop.f32.mrb[10].mxu1 }
 0x41d   :  { %v638_v51 = vpack.c.bf16 %v590_v50, %v587_v48  ;;  %v910_v52 = vpop.f32.mrb[11].mxu1 }
 0x41f   :  { %933 = vmatprep.mubr.bf16.mxu1 %v638_v51 }
 0x422   :  { %v631_v53 = vpop.f32.mrb[16].mxu0 }
 0x423   :  { %v915_v54 = vpop.f32.mrb[17].mxu0 }
 0x424   :  { %v634_v55 = vpop.f32.mrb[18].mxu0 }
 0x425   :  { %v639_v56 = vpack.c.bf16 %v634_v55, %v631_v53  ;;  %v916_v57 = vpop.f32.mrb[19].mxu0 }
 0x427   :  { %934 = vmatmul.mubr.bf16.vlgmr.msra.gmra.mrb[12].mxu1 %v639_v56 }
 0x4fa   :  { %v935_v59 = vpop.f32.mrb[12].mxu1 }
 0x4fb   :  { %v754_v60 = vadd.f32 %v935_v59, %v818_v58  ;;  %v745_v61 = vpop.f32.mrb[13].mxu1 }
 0x4fc   :  { %v746_v62 = vadd.f32 %v818_v58, %v745_v61  ;;  %v936_v63 = vpop.f32.mrb[14].mxu1 }
 0x4fd   :  { %762 = vst [vmem:[#allocation7 + $0x10] sm:$0xff] %v754_v60  ;;  %v757_v0 = vadd.f32 %v936_v63, %v818_v58  ;;  %v748_v1 = vpop.f32.mrb[15].mxu1 }
 0x4fe   :  { %760 = vst [vmem:[#allocation7] sm:$0xff] %v746_v62  ;;  %v749_v2 = vadd.f32 %v818_v58, %v748_v1 }
 0x4ff   :  { %763 = vst [vmem:[#allocation7 + $0x18] sm:$0xff] %v757_v0 }
 0x500   :  { %761 = vst [vmem:[#allocation7 + $0x8] sm:$0xff] %v749_v2 }
 0x501   :  { %1050 = shalt.err (!%p1047_p6)
}
 0x502   :  { %s1051_s20 = scalar_lea.hbm %s1223_s6, 512 }
 0x503   :  { %p1052_p7 = scmp.ne.s32.totalorder %s1223_s6, %s1051_s20  ;;  %p1055_p8 = scmp.lt.u32.totalorder %s1051_s20, %s1223_s6 }
 0x505   :  { %p1057_p9 = pnand %p1055_p8, %p1052_p7 }
 0x507   :  { %1060 = shalt.err (!%p1057_p9)
}
 0x508   :  { %s1077_s24 = smov 128   ;;  %s1078_s25 = smov 8  }
 0x509   :  { %775 = dma.vmem_to_hbm [thread:$0]  %s770_s17, 512, %s1223_s6, [#allocation4], %s1077_s24, %s1077_s24, %s1078_s25  }
 0x50a   :  { %1065 = dma.done.wait [#allocation4], 512  }
 0x50b   :  { %1066 = vsyncadd [#allocation4], 4294966784 }
 0x50c   :  { %779 = vsyncpa [#allocation3], 1 }
 0x50d   :  { %780 = vsyncpa [#allocation6], 1 }
 0x50e   :  { %781 = vsyncpa [#allocation4], 1 }

</bundles_post_ra>
